<compile_context>
chip_gen: v7x
topology: tpu7x:2x2x1
jax: 0.10.0
libtpu: 0.0.40
codegen_flags: <defaults>
</compile_context>

<pallas_src>
import functools

import jax
import jax.numpy as jnp
from jax.experimental import pallas as pl
from jax.experimental.pallas import tpu as pltpu


def _round_up(n: int, m: int) -> int:
    return -(-n // m) * m


def _vmem_capacity_bytes() -> int:
    """Physical VMEM per TensorCore (64 MiB on v7x, 128 MiB on v5e/v6e)."""
    try:
        return int(pltpu.get_tpu_info().vmem_capacity_bytes)
    except Exception:
        return 64 * 1024 * 1024  # conservative fallback, safe on every generation


def _recip(d):
    """1/d via the EUP approx reciprocal, refined with one Newton step (~f32 accurate)."""
    r = pl.reciprocal(d, approx=True)
    return r * (2.0 - d * r)


def _stable_sigmoid(t):
    """Numerically stable sigmoid; the reciprocal operand stays in (1, 2]."""
    e = jnp.exp(-jnp.abs(t))
    r = _recip(1.0 + e)
    return jnp.where(t >= 0, r, e * r)


def _policy_kernel(x_ref, w1_ref, b1_ref, w2_ref, b2_ref, oT_ref, *, num_outputs):
    # Hidden layer straight from the native-(TB, I) x block:
    #   (H, I) . (TB, I) contracting the last dims -> (H, TB), f32 accumulation.
    h = jax.lax.dot_general(
        w1_ref[...], x_ref[...],
        dimension_numbers=(((1,), (1,)), ((), ())),
        preferred_element_type=jnp.float32)
    h = jnp.maximum(h + b1_ref[...].astype(jnp.float32), 0.0)

    # Output layer: (O, H) . (H, TB) -> (O, TB)
    logits = jnp.dot(w2_ref[...], h.astype(w2_ref.dtype),
                     preferred_element_type=jnp.float32)
    logits = logits + b2_ref[...].astype(jnp.float32)

    if num_outputs == 1:
        out = _stable_sigmoid(logits)                                   # nn.Sigmoid()
    elif num_outputs == 2:
        # softmax over 2 classes == sigmoid of the logit difference (exact; no reductions).
        p1 = _stable_sigmoid(logits[1:2, :] - logits[0:1, :])           # (1, TB)
        row = jax.lax.broadcasted_iota(jnp.int32, logits.shape, 0)      # (2, TB)
        out = jnp.where(row == 1, p1, 1.0 - p1)
    else:
        # nn.Softmax over the class (sublane) axis, numerically stable.
        m = jnp.max(logits, axis=0, keepdims=True)
        e = jnp.exp(logits - m)
        out = e * _recip(jnp.sum(e, axis=0, keepdims=True))

    oT_ref[...] = out.astype(oT_ref.dtype)


def _choose_batch_tile(batch, num_inputs, num_hidden, num_outputs, x_itemsize,
                       vmem_budget_bytes, *, min_steps=4, max_tile=131072):
    """Largest lane-aligned batch tile whose working set fits the VMEM budget, while
    keeping a few grid steps alive for DMA overlap / multi-core sharding."""
    del num_inputs  # I is folded into the 128-lane padding of the x block below.
    if batch <= 128:
        return batch  # single exact-fit block (block dims == full array dims)

    h_pad = _round_up(num_hidden, 8)
    o_pad = _round_up(max(num_outputs, 1), 8)
    # Per-batch-column VMEM bytes (the (TB, I) x block is lane-padded to 128 in VMEM):
    per_col = (2 * 128 * x_itemsize     # double-buffered x block
               + 8 * 4                  # transposed-x staging (I padded to 8 sublanes, f32)
               + 3 * h_pad * 4          # hidden activation + elementwise temps (f32)
               + 6 * o_pad * 4)         # logits/exp/prob temps + double-buffered f32 out block
    fixed = (2 * 128 * (h_pad + o_pad) * (x_itemsize + 4)  # W1/W2 (+ f32 b1/b2), dbl-buffered
             + (1 << 20))                                   # compiler-internal scratch reserve
    cols = max(0, vmem_budget_bytes - fixed) // per_col
    tile_vmem = max(128, (cols // 128) * 128)

    # Keep >= min_steps grid steps so the pipeline overlaps and v7x can spread tiles
    # across its two TensorCores.
    tile_grid = _round_up(pl.cdiv(batch, min_steps), 128)
    return max(128, min(tile_vmem, tile_grid, max_tile))


def policy_forward(x, w1, b1, w2, b2, *, compute_dtype=None, batch_tile=None,
                   transposed_output=False, core_parallel=False):
    """Forward pass of Policy.

    x:  (B, num_inputs)                 -- native layout, consumed directly (no x^T pass)
    w1: (num_hidden, num_inputs)   b1: (num_hidden,)      -- PyTorch nn.Linear layout
    w2: (num_outputs, num_hidden)  b2: (num_outputs,)

    Returns probabilities of shape (B, num_outputs) float32 (or (num_outputs, B) if
    transposed_output=True, which skips the final HBM transpose pass).

    compute_dtype=jnp.bfloat16 casts x/W1/W2 to bf16 (f32 accumulation kept). For large
    batches, prefer feeding bf16 x directly so the cast is not an extra HBM pass.
    """
    batch, num_inputs = x.shape
    num_hidden = w1.shape[0]
    num_outputs = w2.shape[0]

    if compute_dtype is not None and x.dtype != jnp.dtype(compute_dtype):
        x = x.astype(compute_dtype)
    wdt = x.dtype
    w1c = w1.astype(wdt)                                   # (H, I)
    w2c = w2.astype(wdt)                                   # (O, H)
    b1c = b1.reshape(num_hidden, 1).astype(jnp.float32)    # biases stay f32 (tiny)
    b2c = b2.reshape(num_outputs, 1).astype(jnp.float32)
    x_itemsize = jnp.dtype(wdt).itemsize

    vmem_cap = _vmem_capacity_bytes()
    if batch_tile is None:
        batch_tile = _choose_batch_tile(batch, num_inputs, num_hidden, num_outputs,
                                        x_itemsize, int(0.65 * vmem_cap))
    if batch_tile >= batch:
        batch_tile = batch                                 # single exact-fit block
    else:
        assert batch_tile % 128 == 0, \
            "batch_tile must be a multiple of 128 unless it covers the whole batch"

    grid = (pl.cdiv(batch, batch_tile),)
    dim_sem = (pltpu.CORE_PARALLEL if core_parallel else "parallel",)

    cost = pl.CostEstimate(
        flops=2 * batch * num_hidden * (num_inputs + num_outputs),
        transcendentals=batch * max(num_outputs, 1),
        bytes_accessed=(batch * num_inputs * x_itemsize
                        + (num_hidden * num_inputs + num_outputs * num_hidden) * x_itemsize
                        + (num_hidden + num_outputs) * 4
                        + num_outputs * batch * 4),
    )

    out_t = pl.pallas_call(
        functools.partial(_policy_kernel, num_outputs=num_outputs),
        out_shape=jax.ShapeDtypeStruct((num_outputs, batch), jnp.float32),
        grid=grid,
        in_specs=[
            pl.BlockSpec((batch_tile, num_inputs), lambda i: (i, 0)),    # x tile (pipelined)
            pl.BlockSpec((num_hidden, num_inputs), lambda i: (0, 0)),    # W1 (VMEM-resident)
            pl.BlockSpec((num_hidden, 1), lambda i: (0, 0)),             # b1
            pl.BlockSpec((num_outputs, num_hidden), lambda i: (0, 0)),   # W2
            pl.BlockSpec((num_outputs, 1), lambda i: (0, 0)),            # b2
        ],
        out_specs=pl.BlockSpec((num_outputs, batch_tile), lambda i: (0, i)),  # lane-dense out
        compiler_params=pltpu.CompilerParams(
            dimension_semantics=dim_sem,
            vmem_limit_bytes=int(0.85 * vmem_cap),
        ),
        cost_estimate=cost,
    )(x, w1c, b1c, w2c, b2c)

    if transposed_output:
        return out_t                                       # (O, B), no extra HBM pass
    return out_t.T                                         # (B, O), matches the PyTorch module


def init_policy_params(key, num_inputs, num_hidden, num_outputs):
    """Deterministic init mimicking nn.Linear defaults (uniform +/- 1/sqrt(fan_in)),
    stored in PyTorch layout: W (out_features, in_features), b (out_features,)."""
    k1, k2, k3, k4 = jax.random.split(key, 4)
    bound1 = 1.0 / (num_inputs ** 0.5)
    bound2 = 1.0 / (num_hidden ** 0.5)
    w1 = jax.random.uniform(k1, (num_hidden, num_inputs), jnp.float32, -bound1, bound1)
    b1 = jax.random.uniform(k2, (num_hidden,), jnp.float32, -bound1, bound1)
    w2 = jax.random.uniform(k3, (num_outputs, num_hidden), jnp.float32, -bound2, bound2)
    b2 = jax.random.uniform(k4, (num_outputs,), jnp.float32, -bound2, bound2)
    return w1, b1, w2, b2


def _reference(x, w1, b1, w2, b2):
    """Pure-JAX reference matching the PyTorch module forward."""
    xf = x.astype(jnp.float32)
    h = jnp.maximum(xf @ w1.T + b1, 0.0)
    logits = h @ w2.T + b2
    if w2.shape[0] == 1:
        return jax.nn.sigmoid(logits)
    return jax.nn.softmax(logits, axis=-1)


if __name__ == "__main__":
    key = jax.random.PRNGKey(0)
    num_inputs, num_hidden, num_outputs = 4, 32, 2

    # Case 1: softmax head, small batch -> single exact-fit block.
    batch = 8
    kx, kp, key = jax.random.split(key, 3)
    x = jax.random.normal(kx, (batch, num_inputs), jnp.float32)
    params = init_policy_params(kp, num_inputs, num_hidden, num_outputs)
    out = jax.block_until_ready(policy_forward(x, *params))
    ref = _reference(x, *params)
    assert out.shape == (batch, num_outputs)
    assert jnp.allclose(out, ref, atol=1e-4, rtol=1e-4)
    assert jnp.allclose(jnp.sum(out, axis=-1), 1.0, atol=1e-4)

    # Case 2: batch not a multiple of the tile -> multi-step pipelined grid with a
    # partial (masked) final block; exercises the native-layout x path.
    batch2 = 200
    kx2, key = jax.random.split(key)
    x2 = jax.random.normal(kx2, (batch2, num_inputs), jnp.float32)
    out2 = jax.block_until_ready(policy_forward(x2, *params, batch_tile=128))
    ref2 = _reference(x2, *params)
    assert out2.shape == (batch2, num_outputs)
    assert jnp.allclose(out2, ref2, atol=1e-4, rtol=1e-4)

    # Case 3: sigmoid head (num_outputs == 1).
    kx3, kp3, key = jax.random.split(key, 3)
    x3 = jax.random.normal(kx3, (batch, num_inputs), jnp.float32)
    params1 = init_policy_params(kp3, num_inputs, num_hidden, 1)
    out3 = jax.block_until_ready(policy_forward(x3, *params1))
    ref3 = _reference(x3, *params1)
    assert out3.shape == (batch, 1)
    assert jnp.allclose(out3, ref3, atol=1e-4, rtol=1e-4)

    # Case 4: bf16 compute path (halves x/weight HBM bytes); looser tolerance vs f32 ref.
    batch4 = 256
    kx4, key = jax.random.split(key)
    x4 = jax.random.normal(kx4, (batch4, num_inputs), jnp.float32)
    out4 = jax.block_until_ready(policy_forward(x4, *params, compute_dtype=jnp.bfloat16))
    ref4 = _reference(x4, *params)
    assert out4.shape == (batch4, num_outputs)
    assert jnp.allclose(out4, ref4, atol=2e-2, rtol=2e-2)

    print("KERNEL_OK")
</pallas_src>

<mosaic_0001>
module attributes {stable_mosaic.version = 11 : i64} {
  func.func @_policy_kernel(%arg0: i32, %arg1: memref<8x4xf32, #tpu.memory_space<vmem>>, %arg2: memref<32x4xf32, #tpu.memory_space<vmem>>, %arg3: memref<32x1xf32, #tpu.memory_space<vmem>>, %arg4: memref<2x32xf32, #tpu.memory_space<vmem>>, %arg5: memref<2x1xf32, #tpu.memory_space<vmem>>, %arg6: memref<2x8xf32, #tpu.memory_space<vmem>>) attributes {dimension_semantics = [#tpu.dimension_semantics<parallel>], iteration_bounds = array<i64: 1>, scalar_prefetch = 0 : i64, scratch_operands = 0 : i64, tpu.core_type = #tpu.core_type<tc>, window_params = [{transform_indices = @transform_0, window_bounds = array<i64: 8, 4>}, {pipeline_mode = #tpu.pipeline_mode<synchronous>, transform_indices = @transform_1, window_bounds = array<i64: 32, 4>}, {pipeline_mode = #tpu.pipeline_mode<synchronous>, transform_indices = @transform_2, window_bounds = array<i64: 32, 1>}, {pipeline_mode = #tpu.pipeline_mode<synchronous>, transform_indices = @transform_3, window_bounds = array<i64: 2, 32>}, {pipeline_mode = #tpu.pipeline_mode<synchronous>, transform_indices = @transform_4, window_bounds = array<i64: 2, 1>}, {transform_indices = @transform_5, window_bounds = array<i64: 2, 8>}]} {
    %c0 = arith.constant 0 : index
    %c0_0 = arith.constant 0 : index
    %0 = vector.load %arg2[%c0, %c0_0] : memref<32x4xf32, #tpu.memory_space<vmem>>, vector<32x4xf32>
    %c0_1 = arith.constant 0 : index
    %c0_2 = arith.constant 0 : index
    %1 = vector.load %arg1[%c0_1, %c0_2] : memref<8x4xf32, #tpu.memory_space<vmem>>, vector<8x4xf32>
    %cst = arith.constant dense<0.000000e+00> : vector<32x8xf32>
    %2 = tpu.matmul %0, %1, %cst {dimension_numbers = #tpu.dot_dimension_numbers<[1], [1], [0], [0], [0, 0, 1, 0], [], []>} : vector<32x4xf32>, vector<8x4xf32>, vector<32x8xf32> -> vector<32x8xf32>
    %c0_3 = arith.constant 0 : index
    %c0_4 = arith.constant 0 : index
    %3 = vector.load %arg3[%c0_3, %c0_4] : memref<32x1xf32, #tpu.memory_space<vmem>>, vector<32x1xf32>
    %4 = vector.broadcast %3 : vector<32x1xf32> to vector<32x8xf32>
    %5 = arith.addf %2, %4 : vector<32x8xf32>
    %cst_5 = arith.constant 0.000000e+00 : f32
    %6 = vector.broadcast %cst_5 : f32 to vector<32x8xf32>
    %7 = arith.maximumf %5, %6 : vector<32x8xf32>
    %c0_6 = arith.constant 0 : index
    %c0_7 = arith.constant 0 : index
    %8 = vector.load %arg4[%c0_6, %c0_7] : memref<2x32xf32, #tpu.memory_space<vmem>>, vector<2x32xf32>
    %cst_8 = arith.constant dense<0.000000e+00> : vector<2x8xf32>
    %9 = tpu.matmul %8, %7, %cst_8 {dimension_numbers = #tpu.dot_dimension_numbers<[1], [0], [0], [1], [0, 0, 1, 1], [], []>} : vector<2x32xf32>, vector<32x8xf32>, vector<2x8xf32> -> vector<2x8xf32>
    %c0_9 = arith.constant 0 : index
    %c0_10 = arith.constant 0 : index
    %10 = vector.load %arg5[%c0_9, %c0_10] : memref<2x1xf32, #tpu.memory_space<vmem>>, vector<2x1xf32>
    %11 = vector.broadcast %10 : vector<2x1xf32> to vector<2x8xf32>
    %12 = arith.addf %9, %11 : vector<2x8xf32>
    %13 = vector.extract_strided_slice %12 {offsets = [1, 0], sizes = [1, 8], strides = [1, 1]} : vector<2x8xf32> to vector<1x8xf32>
    %14 = vector.extract_strided_slice %12 {offsets = [0, 0], sizes = [1, 8], strides = [1, 1]} : vector<2x8xf32> to vector<1x8xf32>
    %15 = arith.subf %13, %14 : vector<1x8xf32>
    %16 = math.absf %15 : vector<1x8xf32>
    %cst_11 = arith.constant 0.000000e+00 : f32
    %17 = vector.broadcast %cst_11 : f32 to vector<1x8xf32>
    %18 = arith.subf %17, %16 : vector<1x8xf32>
    %19 = math.exp %18 : vector<1x8xf32>
    %cst_12 = arith.constant 1.000000e+00 : f32
    %20 = vector.broadcast %cst_12 : f32 to vector<1x8xf32>
    %21 = arith.addf %20, %19 : vector<1x8xf32>
    %22 = tpu.reciprocal %21 {approx = true} : vector<1x8xf32> -> vector<1x8xf32>
    %23 = arith.mulf %21, %22 : vector<1x8xf32>
    %cst_13 = arith.constant 2.000000e+00 : f32
    %24 = vector.broadcast %cst_13 : f32 to vector<1x8xf32>
    %25 = arith.subf %24, %23 : vector<1x8xf32>
    %26 = arith.mulf %22, %25 : vector<1x8xf32>
    %cst_14 = arith.constant 0.000000e+00 : f32
    %27 = vector.broadcast %cst_14 : f32 to vector<1x8xf32>
    %28 = arith.cmpf oge, %15, %27 : vector<1x8xf32>
    %29 = arith.mulf %19, %26 : vector<1x8xf32>
    %30 = arith.select %28, %26, %29 : vector<1x8xi1>, vector<1x8xf32>
    %31 = tpu.iota {dimensions = array<i32: 0>} : vector<2x8xi32>
    %c1_i32 = arith.constant 1 : i32
    %32 = vector.broadcast %c1_i32 : i32 to vector<2x8xi32>
    %33 = arith.cmpi eq, %31, %32 : vector<2x8xi32>
    %cst_15 = arith.constant 1.000000e+00 : f32
    %34 = vector.broadcast %cst_15 : f32 to vector<1x8xf32>
    %35 = arith.subf %34, %30 : vector<1x8xf32>
    %36 = vector.shape_cast %30 : vector<1x8xf32> to vector<1x8xf32>
    %37 = vector.broadcast %36 : vector<1x8xf32> to vector<2x8xf32>
    %38 = vector.shape_cast %35 : vector<1x8xf32> to vector<1x8xf32>
    %39 = vector.broadcast %38 : vector<1x8xf32> to vector<2x8xf32>
    %40 = arith.select %33, %37, %39 : vector<2x8xi1>, vector<2x8xf32>
    %c0_16 = arith.constant 0 : index
    %c0_17 = arith.constant 0 : index
    %41 = vector.load %arg6[%c0_16, %c0_17] : memref<2x8xf32, #tpu.memory_space<vmem>>, vector<2x8xf32>
    tpu.vector_store %arg6[%c0_16, %c0_17], %40 {strides = array<i32>} : memref<2x8xf32, #tpu.memory_space<vmem>>, vector<2x8xf32>,
    return
  }
  func.func @transform_0(%arg0: i32) -> (i32, i32) {
    %c0_i32 = arith.constant 0 : i32
    %c0_i32_0 = arith.constant 0 : i32
    return %arg0, %c0_i32 : i32, i32
  }
  func.func @transform_1(%arg0: i32) -> (i32, i32) {
    %c0_i32 = arith.constant 0 : i32
    %c0_i32_0 = arith.constant 0 : i32
    %c0_i32_1 = arith.constant 0 : i32
    return %c0_i32, %c0_i32_0 : i32, i32
  }
  func.func @transform_2(%arg0: i32) -> (i32, i32) {
    %c0_i32 = arith.constant 0 : i32
    %c0_i32_0 = arith.constant 0 : i32
    %c0_i32_1 = arith.constant 0 : i32
    return %c0_i32, %c0_i32_0 : i32, i32
  }
  func.func @transform_3(%arg0: i32) -> (i32, i32) {
    %c0_i32 = arith.constant 0 : i32
    %c0_i32_0 = arith.constant 0 : i32
    %c0_i32_1 = arith.constant 0 : i32
    return %c0_i32, %c0_i32_0 : i32, i32
  }
  func.func @transform_4(%arg0: i32) -> (i32, i32) {
    %c0_i32 = arith.constant 0 : i32
    %c0_i32_0 = arith.constant 0 : i32
    %c0_i32_1 = arith.constant 0 : i32
    return %c0_i32, %c0_i32_0 : i32, i32
  }
  func.func @transform_5(%arg0: i32) -> (i32, i32) {
    %c0_i32 = arith.constant 0 : i32
    %c0_i32_0 = arith.constant 0 : i32
    return %c0_i32, %arg0 : i32, i32
  }
}

</mosaic_0001>

<bundles_post_ra>
// kernel: tpu_custom_call.1
= control target key start
LH: loop header
LB: loop body
LE: loop exit
PB: predicated region body
PF: predicated region fallthrough
CT: control target
= control target key end

     0   :  { %vm50_vm0 = vcmask 31744   ;;  %v357_v4 = vmov 0   ;;  %s443_s0 = inlined_call_operand.vmem [shape: f32[8,4], index: 0, kind: input, shape index: {}]   ;;  %s444_s1 = inlined_call_operand.vmem [shape: f32[32,4], index: 1, kind: input, shape index: {}]   ;;  %s445_s2 = inlined_call_operand.vmem [shape: f32[32,1], index: 2, kind: input, shape index: {}]   ;;  %s446_s3 = inlined_call_operand.vmem [shape: f32[2,32], index: 3, kind: input, shape index: {}]   ;;  %s447_s4 = inlined_call_operand.vmem [shape: f32[2,1], index: 4, kind: input, shape index: {}]   ;;  %s448_s5 = inlined_call_operand.hbm [shape: f32[2,8], index: 5, kind: output, shape index: {}]  }
   0x1   :  { %v25_v0 = vld [vmem:[%s443_s0] sm:$0xff]  ;;  %v22_v3 = vld [vmem:[%s444_s1 + $0x8] sm:$0xff]  ;;  %327 = vset.pattern.permute.xlu0 %v357_v4  ;;  %v28_v5 = vld [vmem:[%s445_s2 + $0x10] sm:$0xff]  ;;  %328 = vset.pattern.permute.xlu1 %v357_v4 }
   0x2   :  { %v21_v1 = vld [vmem:[%s444_s1] sm:$0xff]  ;;  %297 = vmatprep.subr.msk.mxu0 %vm50_vm0, %v25_v0  ;;  %v23_v6 = vld [vmem:[%s444_s1 + $0x10] sm:$0xff] }
   0x3   :  { %299 = vmatprep.mubr.msk.f32.mxu0 %vm50_vm0, %v21_v1  ;;  %v26_v2 = vld [vmem:[%s445_s2] sm:$0xff]  ;;  %298 = vmatpush3.xpose.msk.msra.mxu0 %vm50_vm0, %v25_v0 }
   0x4   :  { %32 = vperm.xlu0 %327, %v26_v2  }
   0x5   :  { %10 = vsyncpa [#allocation3], 0  ;;  %v27_v7 = vld [vmem:[%s445_s2 + $0x8] sm:$0xff]  ;;  %42 = vperm.xlu1 %328, %v28_v5   ;;  %v29_v8 = vld [vmem:[%s445_s2 + $0x18] sm:$0xff]  ;;  %v358_v11 = vmov 0.0|0.0   ;;  %vm359_vm1 = vmmov 0   ;;  %v252_v44 = vlaneseq }
   0x6   :  { %300 = vmatmul.mubr.msk.f32.vlgmr.msra.gmra.mrb[0].mxu0 %vm50_vm0, %v22_v3  ;;  %v24_v9 = vld [vmem:[%s444_s1 + $0x18] sm:$0xff]  ;;  %v156_v10 = vld [vmem:[%s447_s4] sm:$0x3]  ;;  %316 = vmatprep.subr.bf16.mxu1 %v358_v11  ;;  %v360_v12 = vmov 0.0   ;;  %vm162_vm2 = vcmask 261120   ;;  %vm265_vm5 = vcmask 58368  }
   0x7   :  { %302 = vmatprep.mubr.msk.f32.mxu0 %vm50_vm0, %v23_v6  ;;  %313 = vmatprep.mubr.msk.f32.mxu1 %vm359_vm1, %v360_v12  ;;  %v155_v31 = vld [vmem:[%s446_s3] sm:$0x3]  ;;  %v253_v47 = vshrl.u32 %v252_v44, 7  ;;  %s361_s3 = smov [#allocation2]  }
   0x8   :  { %37 = vperm.xlu0 %327, %v27_v7   ;;  %s273_s4 = sshll.u32 %s361_s3, 4  ;;  %s274_s4 = int_to_ptr.vmem [resolvable:$true] %s273_s4 }
   0x9   :  { %47 = vperm.xlu1 %328, %v29_v8   ;;  %v258_v50 = vsub.s32 1, %v253_v47  ;;  %vm254_vm4 = vcmp.eq.s32.totalorder %v253_v47, 1  ;;  %s333_s12 = scalar_lea.vmem %s274_s4, 32  ;;  %p338_p1 = scmp.lt.s32.totalorder %s274_s4, %s274_s4 }
   0xa   :  { %303 = vmatmul.mubr.msk.f32.gmra.mrb[2].mxu0 %vm50_vm0, %v24_v9  ;;  %p334_p0 = scmp.ne.s32.totalorder %s274_s4, %s333_s12  ;;  %p339_p2 = scmp.lt.s32.totalorder %s333_s12, %s333_s12 }
   0xc   :  { %159 = vperm.xlu0 %327, %v156_v10   ;;  %p340_p3 = por %p339_p2, %p338_p1 }
   0xe   :  { %p341_p4 = pnand %p340_p3, %p334_p0 }
  0x83   :  { %v33_v13 = vpop.permute.xlu0 %32 }
  0x84   :  { %v43_v14 = vpop.permute.xlu1 %42 }
  0x87   :  { %v38_v15 = vpop.permute.xlu0 %37 }
  0x88   :  { %v48_v21 = vpop.permute.xlu1 %47 }
  0x8b   :  { %v160_v32 = vpop.permute.xlu0 %159 }
  0xd9   :  { %v301_v16 = vpop.f32.mrb[0].mxu0 }
  0xda   :  { %v138_v17 = vadd.f32 %v301_v16, %v38_v15  ;;  %v132_v18 = vpop.f32.mrb[1].mxu0 }
  0xdb   :  { %v133_v19 = vadd.f32 %v132_v18, %v33_v13 }
  0xdc   :  { %v152_v20 = vmax.f32 %v138_v17, 0.0 }
  0xdd   :  { %v151_v22 = vmax.f32 %v133_v19, 0.0  ;;  %v304_v23 = vpop.f32.mrb[2].mxu0 }
  0xde   :  { %v148_v24 = vadd.f32 %v304_v23, %v48_v21  ;;  %v142_v25 = vpop.f32.mrb[3].mxu0 }
  0xdf   :  { %v143_v26 = vadd.f32 %v142_v25, %v43_v14  ;;  %v317_v27 = vpack.c.bf16 %v152_v20, %v151_v22 }
  0xe0   :  { %v154_v28 = vmax.f32 %v148_v24, 0.0 }
  0xe1   :  { %v153_v29 = vmax.f32 %v143_v26, 0.0  ;;  %318 = vmatpush3.bf16.msra.mxu1 %v317_v27 }
  0xe2   :  { %319 = vmatprep.subr.bf16.mxu1 %v358_v11 }
  0xe3   :  { %v320_v30 = vpack.c.bf16 %v154_v28, %v153_v29 }
  0xe5   :  { %321 = vmatpush3.bf16.msra.mxu1 %v320_v30 }
  0xe8   :  { %314 = vmatmul.mubr.msk.f32.vlgmr.msra.gmra.mrb[0].mxu1 %vm162_vm2, %v155_v31 }
 0x1bb   :  { %v232_v33 = vpop.f32.mrb[0].mxu1 }
 0x1bc   :  { %v233_v34 = vadd.f32 %v232_v33, %v160_v32  ;;  %v315_v35 = vpop.f32.mrb[1].mxu1 }
 0x1be   :  { %v237_v36 = vrot.slane %v233_v34, 7 }
 0x1c0   :  { %v239_v37 = vsub.f32 %v233_v34, %v237_v36 }
 0x1c2   :  { %v240_v38 = vand.u32 2147483647, %v239_v37  ;;  %vm249_vm3 = vcmp.ge.f32.partialorder %v239_v37, 0.0 }
 0x1c4   :  { %v241_v39 = vsub.f32 0.0, %v240_v38 }
 0x1c6   :  { %v242_v40 = vmul.f32 1.442695, %v241_v39 }
 0x1c8   :  { %329 = vpow2.f32 %v242_v40 }
 0x1d2   :  { %v330_v41 = vpop.eup %329 }
 0x1d3   :  { %v244_v42 = vadd.f32 1.0, %v330_v41 }
 0x1d5   :  { %331 = vrcp.f32 %v244_v42 }
 0x1df   :  { %v332_v43 = vpop.eup %331 }
 0x1e0   :  { %v246_v45 = vmul.f32 %v332_v43, %v244_v42 }
 0x1e2   :  { %v247_v46 = vsub.f32 2.0, %v246_v45 }
 0x1e4   :  { %v248_v48 = vmul.f32 %v332_v43, %v247_v46 }
 0x1e6   :  { %v250_v49 = vmul.f32 %v330_v41, %v248_v48 }
 0x1e8   :  { %v251_v51 = vsel %vm249_vm3, %v248_v48, %v250_v49 }
 0x1e9   :  { %v255_v52 = vsub.f32 1.0, %v251_v51  ;;  %v259_v53 = vrot.slane %v251_v51, %v258_v50 }
 0x1eb   :  { %v263_v54 = vrot.slane %v255_v52, %v258_v50 }
 0x1ed   :  { %v264_v55 = vsel %vm254_vm4, %v259_v53, %v263_v54 }
 0x1ee   :  { %266 = vst.msk [vmem:[#allocation2] sm:$0x3] %vm265_vm5, %v264_v55 }
 0x1ef   :  { %344 = shalt.err (!%p341_p4)
}
 0x1f0   :  { %s345_s15 = scalar_lea.hbm %s448_s5, 32 }
 0x1f1   :  { %p346_p5 = scmp.ne.s32.totalorder %s448_s5, %s345_s15  ;;  %p349_p6 = scmp.lt.u32.totalorder %s345_s15, %s448_s5 }
 0x1f3   :  { %p351_p7 = pnand %p349_p6, %p346_p5 }
 0x1f5   :  { %354 = shalt.err (!%p351_p7)
}
 0x1f6   :  { %276 = dma.vmem_to_hbm [thread:$0]  %s274_s4, 32, %s448_s5, [#allocation3]  }
 0x1f7   :  { %355 = dma.done.wait [#allocation3], 32  }
 0x1f8   :  { %356 = vsyncadd [#allocation3], 4294967264 }
 0x1f9   :  { %280 = vsyncpa [#allocation3], 1 }

</bundles_post_ra>
